<compile_context>
chip_gen: v6e
topology: v6e:2x2x1
jax: 0.10.0
libtpu: 0.0.40
codegen_flags: <defaults>
</compile_context>

<pallas_src>
import numpy as np
import jax
import jax.numpy as jnp
from jax import lax
from jax.experimental import pallas as pl
from jax.experimental.pallas import tpu as pltpu

NEG_SLOPE = 0.2   # GATConv default leaky-relu slope
LN_EPS = 1e-5     # nn.LayerNorm default eps


def _vmem():
    return pl.BlockSpec(memory_space=pltpu.MemorySpace.VMEM)


# ---------------------------------------------------------------------------
# Fused forward kernel factory (num_convs GAT layers + relu/LN + MLP + lsm).
# Ref layout:  x, adj,
#              per conv layer: w, b, att_src, att_dst, ln_gamma, ln_beta,
#              post_mp: w1, b1, w2, b2, w3, b3,
#              outputs: emb, relu_0 .. relu_{L-1}, log_probs
# ---------------------------------------------------------------------------
def _make_fused_kernel(num_convs):

    def kernel(*refs):
        n_in = 2 + 6 * num_convs + 6
        x_ref, adj_ref = refs[0], refs[1]
        conv_refs = refs[2:2 + 6 * num_convs]
        mw1, mb1, mw2, mb2, mw3, mb3 = refs[2 + 6 * num_convs:n_in]
        out_refs = refs[n_in:]
        emb_ref = out_refs[0]
        relu_refs = out_refs[1:1 + num_convs]
        logp_ref = out_refs[1 + num_convs]

        # Adjacency mask (adj[dst, src] incl. self loops), computed once.
        mask = adj_ref[...] > 0

        def bf16_dot(a, b):
            # MXU-native operands, f32 accumulation.
            return jnp.dot(a.astype(jnp.bfloat16), b.astype(jnp.bfloat16),
                           preferred_element_type=jnp.float32)

        def gat(x, w_ref, b_ref, asrc_ref, adst_ref):
            h = bf16_dot(x, w_ref[...])                              # (N, H)
            # Per-node attention logits; scores[i, j] = lrelu(ed[i] + es[j]).
            ed = jnp.dot(h, adst_ref[...],
                         preferred_element_type=jnp.float32)         # (N, 1)
            es_row = lax.dot_general(asrc_ref[...], h,
                                     (((0,), (1,)), ((), ())),
                                     preferred_element_type=jnp.float32)  # (1, N)
            s = ed + es_row                                          # (N, N)
            s = jnp.where(s > 0, s, NEG_SLOPE * s)                   # leaky relu
            s = jnp.where(mask, s, jnp.float32(-1e30))
            m = jnp.max(s, axis=-1, keepdims=True)
            e = jnp.exp(s - m)            # masked entries underflow to exactly 0
            denom = jnp.maximum(jnp.sum(e, axis=-1, keepdims=True), 1e-20)
            alpha = e * pl.reciprocal(denom, approx=True)            # (N, N)
            return bf16_dot(alpha, h) + b_ref[...]

        def relu_ln(x, g_ref, b_ref):
            r = jnp.maximum(x, 0.0)
            mu = jnp.mean(r, axis=-1, keepdims=True)
            var = jnp.mean((r - mu) * (r - mu), axis=-1, keepdims=True)
            inv = lax.rsqrt(var + LN_EPS)
            return r, (r - mu) * inv * g_ref[...] + b_ref[...]

        x = x_ref[...]
        h = x
        for l in range(num_convs):
            w_ref, b_ref, asrc_ref, adst_ref, g_ref, be_ref = \
                conv_refs[6 * l:6 * (l + 1)]
            h = gat(x, w_ref, b_ref, asrc_ref, adst_ref)   # pre-activation
            r, x = relu_ln(h, g_ref, be_ref)               # dropout = identity
            relu_refs[l][...] = r
        emb_ref[...] = h                                   # last conv output

        # post_mp: 3 stacked Linears (no activations) + log_softmax(dim=1).
        h1 = bf16_dot(x, mw1[...]) + mb1[...]
        h2 = bf16_dot(h1, mw2[...]) + mb2[...]
        logits = bf16_dot(h2, mw3[...]) + mb3[...]
        zmax = jnp.max(logits, axis=-1, keepdims=True)
        z = logits - zmax
        lse = jnp.log(jnp.sum(jnp.exp(z), axis=-1, keepdims=True))
        logp_ref[...] = z - lse

    return kernel


# ---------------------------------------------------------------------------
# Wrapper: single fused pallas_call.  Returns (emb, [relu per conv], logp).
# ---------------------------------------------------------------------------
def gnn_forward(params, x, adj):
    num_convs = len(params["convs"])
    n = x.shape[0]
    hh = params["convs"][0]["w"].shape[1]
    odim = params["post_mp"]["w3"].shape[1]

    inputs = [x, adj]
    for c, ln in zip(params["convs"], params["lns"]):
        inputs += [c["w"], c["b"], c["att_src"], c["att_dst"],
                   ln["gamma"], ln["beta"]]
    mp = params["post_mp"]
    inputs += [mp["w1"], mp["b1"], mp["w2"], mp["b2"], mp["w3"], mp["b3"]]

    out_shape = tuple(
        [jax.ShapeDtypeStruct((n, hh), jnp.float32)]                 # emb
        + [jax.ShapeDtypeStruct((n, hh), jnp.float32)] * num_convs   # relu(x)
        + [jax.ShapeDtypeStruct((n, odim), jnp.float32)])            # log_probs

    outs = pl.pallas_call(
        _make_fused_kernel(num_convs),
        out_shape=out_shape,
        in_specs=[_vmem()] * len(inputs),
        out_specs=tuple([_vmem()] * len(out_shape)),
    )(*inputs)

    emb = outs[0]
    relus = list(outs[1:1 + num_convs])
    logp = outs[1 + num_convs]
    return emb, relus, logp


gnn_forward_jit = jax.jit(gnn_forward)


# ---------------------------------------------------------------------------
# Pure-jnp f32 reference (same math, no Pallas) for correctness checks.
# ---------------------------------------------------------------------------
def ref_gat(x, w, b, asrc, adst, adj):
    h = x @ w
    ed = h @ adst
    es = h @ asrc
    scores = ed + es.T
    scores = jnp.where(scores > 0, scores, NEG_SLOPE * scores)
    scores = jnp.where(adj > 0, scores, -1e30)
    scores = scores - jnp.max(scores, axis=-1, keepdims=True)
    e = jnp.exp(scores) * (adj > 0)
    alpha = e / jnp.sum(e, axis=-1, keepdims=True)
    return alpha @ h + b


def ref_forward(params, x, adj):
    relus = []
    emb = None
    for c, ln in zip(params["convs"], params["lns"]):
        x = ref_gat(x, c["w"], c["b"], c["att_src"], c["att_dst"], adj)
        emb = x
        r = jnp.maximum(x, 0.0)
        relus.append(r)
        mu = jnp.mean(r, axis=-1, keepdims=True)
        var = jnp.mean((r - mu) ** 2, axis=-1, keepdims=True)
        x = (r - mu) / jnp.sqrt(var + LN_EPS) * ln["gamma"] + ln["beta"]
    mp = params["post_mp"]
    x = x @ mp["w1"] + mp["b1"]
    x = x @ mp["w2"] + mp["b2"]
    x = x @ mp["w3"] + mp["b3"]
    return emb, relus, jax.nn.log_softmax(x, axis=1)


# ---------------------------------------------------------------------------
def init_params(key, input_dim, hidden_dim, dense_hidden_dim, output_dim,
                num_layers, heads=1):
    hh = hidden_dim * heads
    dims = [input_dim] + [hh] * num_layers   # conv1 + num_layers convs
    convs, lns = [], []
    for fin in dims:
        key, k1, k2, k3, k4 = jax.random.split(key, 5)
        convs.append(dict(
            w=0.1 * jax.random.normal(k1, (fin, hh), jnp.float32),
            att_src=0.1 * jax.random.normal(k2, (hh, 1), jnp.float32),
            att_dst=0.1 * jax.random.normal(k3, (hh, 1), jnp.float32),
            b=0.1 * jax.random.normal(k4, (1, hh), jnp.float32),
        ))
        lns.append(dict(gamma=jnp.ones((1, hh), jnp.float32),
                        beta=jnp.zeros((1, hh), jnp.float32)))
    d2 = dense_hidden_dim // 2
    key, k1, k2, k3, k4, k5, k6 = jax.random.split(key, 7)
    post_mp = dict(
        w1=0.1 * jax.random.normal(k1, (hh, dense_hidden_dim), jnp.float32),
        b1=0.1 * jax.random.normal(k2, (1, dense_hidden_dim), jnp.float32),
        w2=0.1 * jax.random.normal(k3, (dense_hidden_dim, d2), jnp.float32),
        b2=0.1 * jax.random.normal(k4, (1, d2), jnp.float32),
        w3=0.1 * jax.random.normal(k5, (d2, output_dim), jnp.float32),
        b3=0.1 * jax.random.normal(k6, (1, output_dim), jnp.float32),
    )
    return dict(convs=convs, lns=lns, post_mp=post_mp)


if __name__ == "__main__":
    # Small config consistent with the module's __init__.
    N_NODES, INPUT_DIM, HIDDEN_DIM = 8, 16, 32
    DENSE_HIDDEN_DIM, OUTPUT_DIM, NUM_LAYERS, HEADS = 32, 4, 2, 1

    key = jax.random.PRNGKey(0)
    key, kx, ke = jax.random.split(key, 3)

    x = jax.random.normal(kx, (N_NODES, INPUT_DIM), jnp.float32)

    # Random directed edge_index (2, E); adjacency adj[dst, src] = 1, plus
    # self-loops (GATConv add_self_loops=True default).
    num_edges = 16
    src = jax.random.randint(ke, (num_edges,), 0, N_NODES)
    dst = (src + 1 + jax.random.randint(jax.random.fold_in(ke, 1),
                                        (num_edges,), 0, N_NODES - 1)) % N_NODES
    adj_np = np.zeros((N_NODES, N_NODES), np.float32)
    adj_np[np.asarray(dst), np.asarray(src)] = 1.0
    adj_np[np.arange(N_NODES), np.arange(N_NODES)] = 1.0  # self-loops
    adj_f32 = jnp.asarray(adj_np)                 # reference mask
    adj_bf16 = adj_f32.astype(jnp.bfloat16)       # kernel mask (0/1 exact)

    params = init_params(key, INPUT_DIM, HIDDEN_DIM, DENSE_HIDDEN_DIM,
                         OUTPUT_DIM, NUM_LAYERS, HEADS)

    emb, relus, log_probs = gnn_forward_jit(params, x, adj_bf16)
    jax.block_until_ready(log_probs)

    # Host-side bookkeeping (matches torch: input + relu after each conv).
    embeddings = [np.asarray(x)] + [np.asarray(r) for r in relus]

    # Correctness check against the pure-f32 jnp reference (kernel uses bf16
    # matmul operands with f32 accumulation -> loose-ish tolerances).
    ref_emb, ref_relus, ref_logp = ref_forward(params, x, adj_f32)
    np.testing.assert_allclose(np.asarray(log_probs), np.asarray(ref_logp),
                               rtol=2e-2, atol=2e-2)
    np.testing.assert_allclose(np.asarray(emb), np.asarray(ref_emb),
                               rtol=2e-2, atol=2e-2)
    for r, rr in zip(relus, ref_relus):
        np.testing.assert_allclose(np.asarray(r), np.asarray(rr),
                                   rtol=2e-2, atol=2e-2)

    assert emb.shape == (N_NODES, HIDDEN_DIM * HEADS)
    assert log_probs.shape == (N_NODES, OUTPUT_DIM)
    assert len(embeddings) == NUM_LAYERS + 2  # input + relu after each conv

    print("KERNEL_OK")
</pallas_src>

<mosaic_0001>
module attributes {stable_mosaic.version = 11 : i64} {
  func.func @kernel(%arg0: memref<8x16xf32, #tpu.memory_space<vmem>>, %arg1: memref<8x8xbf16, #tpu.memory_space<vmem>>, %arg2: memref<16x32xf32, #tpu.memory_space<vmem>>, %arg3: memref<1x32xf32, #tpu.memory_space<vmem>>, %arg4: memref<32x1xf32, #tpu.memory_space<vmem>>, %arg5: memref<32x1xf32, #tpu.memory_space<vmem>>, %arg6: memref<1x32xf32, #tpu.memory_space<vmem>>, %arg7: memref<1x32xf32, #tpu.memory_space<vmem>>, %arg8: memref<32x32xf32, #tpu.memory_space<vmem>>, %arg9: memref<1x32xf32, #tpu.memory_space<vmem>>, %arg10: memref<32x1xf32, #tpu.memory_space<vmem>>, %arg11: memref<32x1xf32, #tpu.memory_space<vmem>>, %arg12: memref<1x32xf32, #tpu.memory_space<vmem>>, %arg13: memref<1x32xf32, #tpu.memory_space<vmem>>, %arg14: memref<32x32xf32, #tpu.memory_space<vmem>>, %arg15: memref<1x32xf32, #tpu.memory_space<vmem>>, %arg16: memref<32x1xf32, #tpu.memory_space<vmem>>, %arg17: memref<32x1xf32, #tpu.memory_space<vmem>>, %arg18: memref<1x32xf32, #tpu.memory_space<vmem>>, %arg19: memref<1x32xf32, #tpu.memory_space<vmem>>, %arg20: memref<32x32xf32, #tpu.memory_space<vmem>>, %arg21: memref<1x32xf32, #tpu.memory_space<vmem>>, %arg22: memref<32x16xf32, #tpu.memory_space<vmem>>, %arg23: memref<1x16xf32, #tpu.memory_space<vmem>>, %arg24: memref<16x4xf32, #tpu.memory_space<vmem>>, %arg25: memref<1x4xf32, #tpu.memory_space<vmem>>, %arg26: memref<8x32xf32, #tpu.memory_space<vmem>>, %arg27: memref<8x32xf32, #tpu.memory_space<vmem>>, %arg28: memref<8x32xf32, #tpu.memory_space<vmem>>, %arg29: memref<8x32xf32, #tpu.memory_space<vmem>>, %arg30: memref<8x4xf32, #tpu.memory_space<vmem>>) attributes {dimension_semantics = [], scalar_prefetch = 0 : i64, scratch_operands = 0 : i64, tpu.core_type = #tpu.core_type<tc>} {
    %c0 = arith.constant 0 : index
    %c0_0 = arith.constant 0 : index
    %0 = vector.load %arg1[%c0, %c0_0] : memref<8x8xbf16, #tpu.memory_space<vmem>>, vector<8x8xbf16>
    %cst = arith.constant 0.000000e+00 : bf16
    %1 = vector.broadcast %cst : bf16 to vector<8x8xbf16>
    %2 = arith.cmpf ogt, %0, %1 : vector<8x8xbf16>
    %c0_1 = arith.constant 0 : index
    %c0_2 = arith.constant 0 : index
    %3 = vector.load %arg0[%c0_1, %c0_2] : memref<8x16xf32, #tpu.memory_space<vmem>>, vector<8x16xf32>
    %c0_3 = arith.constant 0 : index
    %c0_4 = arith.constant 0 : index
    %4 = vector.load %arg2[%c0_3, %c0_4] : memref<16x32xf32, #tpu.memory_space<vmem>>, vector<16x32xf32>
    %5 = arith.truncf %3 : vector<8x16xf32> to vector<8x16xbf16>
    %6 = arith.truncf %4 : vector<16x32xf32> to vector<16x32xbf16>
    %cst_5 = arith.constant dense<0.000000e+00> : vector<8x32xf32>
    %7 = tpu.matmul %5, %6, %cst_5 {dimension_numbers = #tpu.dot_dimension_numbers<[1], [0], [0], [1], [0, 0, 1, 1], [], []>} : vector<8x16xbf16>, vector<16x32xbf16>, vector<8x32xf32> -> vector<8x32xf32>
    %c0_6 = arith.constant 0 : index
    %c0_7 = arith.constant 0 : index
    %8 = vector.load %arg5[%c0_6, %c0_7] : memref<32x1xf32, #tpu.memory_space<vmem>>, vector<32x1xf32>
    %cst_8 = arith.constant dense<0.000000e+00> : vector<8x1xf32>
    %9 = tpu.matmul %7, %8, %cst_8 {dimension_numbers = #tpu.dot_dimension_numbers<[1], [0], [0], [1], [0, 0, 1, 1], [], []>} : vector<8x32xf32>, vector<32x1xf32>, vector<8x1xf32> -> vector<8x1xf32>
    %c0_9 = arith.constant 0 : index
    %c0_10 = arith.constant 0 : index
    %10 = vector.load %arg4[%c0_9, %c0_10] : memref<32x1xf32, #tpu.memory_space<vmem>>, vector<32x1xf32>
    %cst_11 = arith.constant dense<0.000000e+00> : vector<1x8xf32>
    %11 = tpu.matmul %10, %7, %cst_11 {dimension_numbers = #tpu.dot_dimension_numbers<[0], [1], [1], [0], [0, 1, 1, 0], [], []>} : vector<32x1xf32>, vector<8x32xf32>, vector<1x8xf32> -> vector<1x8xf32>
    %12 = vector.broadcast %9 : vector<8x1xf32> to vector<8x8xf32>
    %13 = vector.broadcast %11 : vector<1x8xf32> to vector<8x8xf32>
    %14 = arith.addf %12, %13 : vector<8x8xf32>
    %cst_12 = arith.constant 0.000000e+00 : f32
    %15 = vector.broadcast %cst_12 : f32 to vector<8x8xf32>
    %16 = arith.cmpf ogt, %14, %15 : vector<8x8xf32>
    %cst_13 = arith.constant 2.000000e-01 : f32
    %17 = vector.broadcast %cst_13 : f32 to vector<8x8xf32>
    %18 = arith.mulf %17, %14 : vector<8x8xf32>
    %19 = arith.select %16, %14, %18 : vector<8x8xi1>, vector<8x8xf32>
    %cst_14 = arith.constant -1.000000e+30 : f32
    %20 = vector.broadcast %cst_14 : f32 to vector<8x8xf32>
    %21 = arith.select %2, %19, %20 : vector<8x8xi1>, vector<8x8xf32>
    %cst_15 = arith.constant dense<0xFF800000> : vector<8xf32>
    %22 = vector.multi_reduction <maximumf>, %21, %cst_15 [1] : vector<8x8xf32> to vector<8xf32>
    %23 = vector.shape_cast %22 : vector<8xf32> to vector<8x1xf32>
    %24 = vector.broadcast %23 : vector<8x1xf32> to vector<8x8xf32>
    %25 = arith.subf %21, %24 : vector<8x8xf32>
    %26 = math.exp %25 : vector<8x8xf32>
    %cst_16 = arith.constant dense<0.000000e+00> : vector<8xf32>
    %27 = vector.multi_reduction <add>, %26, %cst_16 [1] : vector<8x8xf32> to vector<8xf32>
    %28 = vector.shape_cast %27 : vector<8xf32> to vector<8x1xf32>
    %cst_17 = arith.constant 9.99999968E-21 : f32
    %29 = vector.broadcast %cst_17 : f32 to vector<8x1xf32>
    %30 = arith.maximumf %28, %29 : vector<8x1xf32>
    %31 = tpu.reciprocal %30 {approx = true} : vector<8x1xf32> -> vector<8x1xf32>
    %32 = vector.broadcast %31 : vector<8x1xf32> to vector<8x8xf32>
    %33 = arith.mulf %26, %32 : vector<8x8xf32>
    %34 = arith.truncf %33 : vector<8x8xf32> to vector<8x8xbf16>
    %35 = arith.truncf %7 : vector<8x32xf32> to vector<8x32xbf16>
    %cst_18 = arith.constant dense<0.000000e+00> : vector<8x32xf32>
    %36 = tpu.matmul %34, %35, %cst_18 {dimension_numbers = #tpu.dot_dimension_numbers<[1], [0], [0], [1], [0, 0, 1, 1], [], []>} : vector<8x8xbf16>, vector<8x32xbf16>, vector<8x32xf32> -> vector<8x32xf32>
    %c0_19 = arith.constant 0 : index
    %c0_20 = arith.constant 0 : index
    %37 = vector.load %arg3[%c0_19, %c0_20] : memref<1x32xf32, #tpu.memory_space<vmem>>, vector<1x32xf32>
    %38 = vector.broadcast %37 : vector<1x32xf32> to vector<8x32xf32>
    %39 = arith.addf %36, %38 : vector<8x32xf32>
    %cst_21 = arith.constant 0.000000e+00 : f32
    %40 = vector.broadcast %cst_21 : f32 to vector<8x32xf32>
    %41 = arith.maximumf %39, %40 : vector<8x32xf32>
    %cst_22 = arith.constant dense<0.000000e+00> : vector<8xf32>
    %42 = vector.multi_reduction <add>, %41, %cst_22 [1] : vector<8x32xf32> to vector<8xf32>
    %43 = vector.shape_cast %42 : vector<8xf32> to vector<8x1xf32>
    %cst_23 = arith.constant 3.200000e+01 : f32
    %44 = vector.broadcast %cst_23 : f32 to vector<8x1xf32>
    %45 = arith.divf %43, %44 : vector<8x1xf32>
    %46 = vector.broadcast %45 : vector<8x1xf32> to vector<8x32xf32>
    %47 = arith.subf %41, %46 : vector<8x32xf32>
    %48 = vector.broadcast %45 : vector<8x1xf32> to vector<8x32xf32>
    %49 = arith.subf %41, %48 : vector<8x32xf32>
    %50 = arith.mulf %47, %49 : vector<8x32xf32>
    %cst_24 = arith.constant dense<0.000000e+00> : vector<8xf32>
    %51 = vector.multi_reduction <add>, %50, %cst_24 [1] : vector<8x32xf32> to vector<8xf32>
    %52 = vector.shape_cast %51 : vector<8xf32> to vector<8x1xf32>
    %cst_25 = arith.constant 3.200000e+01 : f32
    %53 = vector.broadcast %cst_25 : f32 to vector<8x1xf32>
    %54 = arith.divf %52, %53 : vector<8x1xf32>
    %cst_26 = arith.constant 9.99999974E-6 : f32
    %55 = vector.broadcast %cst_26 : f32 to vector<8x1xf32>
    %56 = arith.addf %54, %55 : vector<8x1xf32>
    %57 = math.rsqrt %56 : vector<8x1xf32>
    %58 = vector.broadcast %45 : vector<8x1xf32> to vector<8x32xf32>
    %59 = arith.subf %41, %58 : vector<8x32xf32>
    %60 = vector.broadcast %57 : vector<8x1xf32> to vector<8x32xf32>
    %61 = arith.mulf %59, %60 : vector<8x32xf32>
    %c0_27 = arith.constant 0 : index
    %c0_28 = arith.constant 0 : index
    %62 = vector.load %arg6[%c0_27, %c0_28] : memref<1x32xf32, #tpu.memory_space<vmem>>, vector<1x32xf32>
    %63 = vector.broadcast %62 : vector<1x32xf32> to vector<8x32xf32>
    %64 = arith.mulf %61, %63 : vector<8x32xf32>
    %c0_29 = arith.constant 0 : index
    %c0_30 = arith.constant 0 : index
    %65 = vector.load %arg7[%c0_29, %c0_30] : memref<1x32xf32, #tpu.memory_space<vmem>>, vector<1x32xf32>
    %66 = vector.broadcast %65 : vector<1x32xf32> to vector<8x32xf32>
    %67 = arith.addf %64, %66 : vector<8x32xf32>
    %c0_31 = arith.constant 0 : index
    %c0_32 = arith.constant 0 : index
    %68 = vector.load %arg27[%c0_31, %c0_32] : memref<8x32xf32, #tpu.memory_space<vmem>>, vector<8x32xf32>
    tpu.vector_store %arg27[%c0_31, %c0_32], %41 {strides = array<i32>} : memref<8x32xf32, #tpu.memory_space<vmem>>, vector<8x32xf32>,
    %c0_33 = arith.constant 0 : index
    %c0_34 = arith.constant 0 : index
    %69 = vector.load %arg8[%c0_33, %c0_34] : memref<32x32xf32, #tpu.memory_space<vmem>>, vector<32x32xf32>
    %70 = arith.truncf %67 : vector<8x32xf32> to vector<8x32xbf16>
    %71 = arith.truncf %69 : vector<32x32xf32> to vector<32x32xbf16>
    %cst_35 = arith.constant dense<0.000000e+00> : vector<8x32xf32>
    %72 = tpu.matmul %70, %71, %cst_35 {dimension_numbers = #tpu.dot_dimension_numbers<[1], [0], [0], [1], [0, 0, 1, 1], [], []>} : vector<8x32xbf16>, vector<32x32xbf16>, vector<8x32xf32> -> vector<8x32xf32>
    %c0_36 = arith.constant 0 : index
    %c0_37 = arith.constant 0 : index
    %73 = vector.load %arg11[%c0_36, %c0_37] : memref<32x1xf32, #tpu.memory_space<vmem>>, vector<32x1xf32>
    %cst_38 = arith.constant dense<0.000000e+00> : vector<8x1xf32>
    %74 = tpu.matmul %72, %73, %cst_38 {dimension_numbers = #tpu.dot_dimension_numbers<[1], [0], [0], [1], [0, 0, 1, 1], [], []>} : vector<8x32xf32>, vector<32x1xf32>, vector<8x1xf32> -> vector<8x1xf32>
    %c0_39 = arith.constant 0 : index
    %c0_40 = arith.constant 0 : index
    %75 = vector.load %arg10[%c0_39, %c0_40] : memref<32x1xf32, #tpu.memory_space<vmem>>, vector<32x1xf32>
    %cst_41 = arith.constant dense<0.000000e+00> : vector<1x8xf32>
    %76 = tpu.matmul %75, %72, %cst_41 {dimension_numbers = #tpu.dot_dimension_numbers<[0], [1], [1], [0], [0, 1, 1, 0], [], []>} : vector<32x1xf32>, vector<8x32xf32>, vector<1x8xf32> -> vector<1x8xf32>
    %77 = vector.broadcast %74 : vector<8x1xf32> to vector<8x8xf32>
    %78 = vector.broadcast %76 : vector<1x8xf32> to vector<8x8xf32>
    %79 = arith.addf %77, %78 : vector<8x8xf32>
    %cst_42 = arith.constant 0.000000e+00 : f32
    %80 = vector.broadcast %cst_42 : f32 to vector<8x8xf32>
    %81 = arith.cmpf ogt, %79, %80 : vector<8x8xf32>
    %cst_43 = arith.constant 2.000000e-01 : f32
    %82 = vector.broadcast %cst_43 : f32 to vector<8x8xf32>
    %83 = arith.mulf %82, %79 : vector<8x8xf32>
    %84 = arith.select %81, %79, %83 : vector<8x8xi1>, vector<8x8xf32>
    %cst_44 = arith.constant -1.000000e+30 : f32
    %85 = vector.broadcast %cst_44 : f32 to vector<8x8xf32>
    %86 = arith.select %2, %84, %85 : vector<8x8xi1>, vector<8x8xf32>
    %cst_45 = arith.constant dense<0xFF800000> : vector<8xf32>
    %87 = vector.multi_reduction <maximumf>, %86, %cst_45 [1] : vector<8x8xf32> to vector<8xf32>
    %88 = vector.shape_cast %87 : vector<8xf32> to vector<8x1xf32>
    %89 = vector.broadcast %88 : vector<8x1xf32> to vector<8x8xf32>
    %90 = arith.subf %86, %89 : vector<8x8xf32>
    %91 = math.exp %90 : vector<8x8xf32>
    %cst_46 = arith.constant dense<0.000000e+00> : vector<8xf32>
    %92 = vector.multi_reduction <add>, %91, %cst_46 [1] : vector<8x8xf32> to vector<8xf32>
    %93 = vector.shape_cast %92 : vector<8xf32> to vector<8x1xf32>
    %cst_47 = arith.constant 9.99999968E-21 : f32
    %94 = vector.broadcast %cst_47 : f32 to vector<8x1xf32>
    %95 = arith.maximumf %93, %94 : vector<8x1xf32>
    %96 = tpu.reciprocal %95 {approx = true} : vector<8x1xf32> -> vector<8x1xf32>
    %97 = vector.broadcast %96 : vector<8x1xf32> to vector<8x8xf32>
    %98 = arith.mulf %91, %97 : vector<8x8xf32>
    %99 = arith.truncf %98 : vector<8x8xf32> to vector<8x8xbf16>
    %100 = arith.truncf %72 : vector<8x32xf32> to vector<8x32xbf16>
    %cst_48 = arith.constant dense<0.000000e+00> : vector<8x32xf32>
    %101 = tpu.matmul %99, %100, %cst_48 {dimension_numbers = #tpu.dot_dimension_numbers<[1], [0], [0], [1], [0, 0, 1, 1], [], []>} : vector<8x8xbf16>, vector<8x32xbf16>, vector<8x32xf32> -> vector<8x32xf32>
    %c0_49 = arith.constant 0 : index
    %c0_50 = arith.constant 0 : index
    %102 = vector.load %arg9[%c0_49, %c0_50] : memref<1x32xf32, #tpu.memory_space<vmem>>, vector<1x32xf32>
    %103 = vector.broadcast %102 : vector<1x32xf32> to vector<8x32xf32>
    %104 = arith.addf %101, %103 : vector<8x32xf32>
    %cst_51 = arith.constant 0.000000e+00 : f32
    %105 = vector.broadcast %cst_51 : f32 to vector<8x32xf32>
    %106 = arith.maximumf %104, %105 : vector<8x32xf32>
    %cst_52 = arith.constant dense<0.000000e+00> : vector<8xf32>
    %107 = vector.multi_reduction <add>, %106, %cst_52 [1] : vector<8x32xf32> to vector<8xf32>
    %108 = vector.shape_cast %107 : vector<8xf32> to vector<8x1xf32>
    %cst_53 = arith.constant 3.200000e+01 : f32
    %109 = vector.broadcast %cst_53 : f32 to vector<8x1xf32>
    %110 = arith.divf %108, %109 : vector<8x1xf32>
    %111 = vector.broadcast %110 : vector<8x1xf32> to vector<8x32xf32>
    %112 = arith.subf %106, %111 : vector<8x32xf32>
    %113 = vector.broadcast %110 : vector<8x1xf32> to vector<8x32xf32>
    %114 = arith.subf %106, %113 : vector<8x32xf32>
    %115 = arith.mulf %112, %114 : vector<8x32xf32>
    %cst_54 = arith.constant dense<0.000000e+00> : vector<8xf32>
    %116 = vector.multi_reduction <add>, %115, %cst_54 [1] : vector<8x32xf32> to vector<8xf32>
    %117 = vector.shape_cast %116 : vector<8xf32> to vector<8x1xf32>
    %cst_55 = arith.constant 3.200000e+01 : f32
    %118 = vector.broadcast %cst_55 : f32 to vector<8x1xf32>
    %119 = arith.divf %117, %118 : vector<8x1xf32>
    %cst_56 = arith.constant 9.99999974E-6 : f32
    %120 = vector.broadcast %cst_56 : f32 to vector<8x1xf32>
    %121 = arith.addf %119, %120 : vector<8x1xf32>
    %122 = math.rsqrt %121 : vector<8x1xf32>
    %123 = vector.broadcast %110 : vector<8x1xf32> to vector<8x32xf32>
    %124 = arith.subf %106, %123 : vector<8x32xf32>
    %125 = vector.broadcast %122 : vector<8x1xf32> to vector<8x32xf32>
    %126 = arith.mulf %124, %125 : vector<8x32xf32>
    %c0_57 = arith.constant 0 : index
    %c0_58 = arith.constant 0 : index
    %127 = vector.load %arg12[%c0_57, %c0_58] : memref<1x32xf32, #tpu.memory_space<vmem>>, vector<1x32xf32>
    %128 = vector.broadcast %127 : vector<1x32xf32> to vector<8x32xf32>
    %129 = arith.mulf %126, %128 : vector<8x32xf32>
    %c0_59 = arith.constant 0 : index
    %c0_60 = arith.constant 0 : index
    %130 = vector.load %arg13[%c0_59, %c0_60] : memref<1x32xf32, #tpu.memory_space<vmem>>, vector<1x32xf32>
    %131 = vector.broadcast %130 : vector<1x32xf32> to vector<8x32xf32>
    %132 = arith.addf %129, %131 : vector<8x32xf32>
    %c0_61 = arith.constant 0 : index
    %c0_62 = arith.constant 0 : index
    %133 = vector.load %arg28[%c0_61, %c0_62] : memref<8x32xf32, #tpu.memory_space<vmem>>, vector<8x32xf32>
    tpu.vector_store %arg28[%c0_61, %c0_62], %106 {strides = array<i32>} : memref<8x32xf32, #tpu.memory_space<vmem>>, vector<8x32xf32>,
    %c0_63 = arith.constant 0 : index
    %c0_64 = arith.constant 0 : index
    %134 = vector.load %arg14[%c0_63, %c0_64] : memref<32x32xf32, #tpu.memory_space<vmem>>, vector<32x32xf32>
    %135 = arith.truncf %132 : vector<8x32xf32> to vector<8x32xbf16>
    %136 = arith.truncf %134 : vector<32x32xf32> to vector<32x32xbf16>
    %cst_65 = arith.constant dense<0.000000e+00> : vector<8x32xf32>
    %137 = tpu.matmul %135, %136, %cst_65 {dimension_numbers = #tpu.dot_dimension_numbers<[1], [0], [0], [1], [0, 0, 1, 1], [], []>} : vector<8x32xbf16>, vector<32x32xbf16>, vector<8x32xf32> -> vector<8x32xf32>
    %c0_66 = arith.constant 0 : index
    %c0_67 = arith.constant 0 : index
    %138 = vector.load %arg17[%c0_66, %c0_67] : memref<32x1xf32, #tpu.memory_space<vmem>>, vector<32x1xf32>
    %cst_68 = arith.constant dense<0.000000e+00> : vector<8x1xf32>
    %139 = tpu.matmul %137, %138, %cst_68 {dimension_numbers = #tpu.dot_dimension_numbers<[1], [0], [0], [1], [0, 0, 1, 1], [], []>} : vector<8x32xf32>, vector<32x1xf32>, vector<8x1xf32> -> vector<8x1xf32>
    %c0_69 = arith.constant 0 : index
    %c0_70 = arith.constant 0 : index
    %140 = vector.load %arg16[%c0_69, %c0_70] : memref<32x1xf32, #tpu.memory_space<vmem>>, vector<32x1xf32>
    %cst_71 = arith.constant dense<0.000000e+00> : vector<1x8xf32>
    %141 = tpu.matmul %140, %137, %cst_71 {dimension_numbers = #tpu.dot_dimension_numbers<[0], [1], [1], [0], [0, 1, 1, 0], [], []>} : vector<32x1xf32>, vector<8x32xf32>, vector<1x8xf32> -> vector<1x8xf32>
    %142 = vector.broadcast %139 : vector<8x1xf32> to vector<8x8xf32>
    %143 = vector.broadcast %141 : vector<1x8xf32> to vector<8x8xf32>
    %144 = arith.addf %142, %143 : vector<8x8xf32>
    %cst_72 = arith.constant 0.000000e+00 : f32
    %145 = vector.broadcast %cst_72 : f32 to vector<8x8xf32>
    %146 = arith.cmpf ogt, %144, %145 : vector<8x8xf32>
    %cst_73 = arith.constant 2.000000e-01 : f32
    %147 = vector.broadcast %cst_73 : f32 to vector<8x8xf32>
    %148 = arith.mulf %147, %144 : vector<8x8xf32>
    %149 = arith.select %146, %144, %148 : vector<8x8xi1>, vector<8x8xf32>
    %cst_74 = arith.constant -1.000000e+30 : f32
    %150 = vector.broadcast %cst_74 : f32 to vector<8x8xf32>
    %151 = arith.select %2, %149, %150 : vector<8x8xi1>, vector<8x8xf32>
    %cst_75 = arith.constant dense<0xFF800000> : vector<8xf32>
    %152 = vector.multi_reduction <maximumf>, %151, %cst_75 [1] : vector<8x8xf32> to vector<8xf32>
    %153 = vector.shape_cast %152 : vector<8xf32> to vector<8x1xf32>
    %154 = vector.broadcast %153 : vector<8x1xf32> to vector<8x8xf32>
    %155 = arith.subf %151, %154 : vector<8x8xf32>
    %156 = math.exp %155 : vector<8x8xf32>
    %cst_76 = arith.constant dense<0.000000e+00> : vector<8xf32>
    %157 = vector.multi_reduction <add>, %156, %cst_76 [1] : vector<8x8xf32> to vector<8xf32>
    %158 = vector.shape_cast %157 : vector<8xf32> to vector<8x1xf32>
    %cst_77 = arith.constant 9.99999968E-21 : f32
    %159 = vector.broadcast %cst_77 : f32 to vector<8x1xf32>
    %160 = arith.maximumf %158, %159 : vector<8x1xf32>
    %161 = tpu.reciprocal %160 {approx = true} : vector<8x1xf32> -> vector<8x1xf32>
    %162 = vector.broadcast %161 : vector<8x1xf32> to vector<8x8xf32>
    %163 = arith.mulf %156, %162 : vector<8x8xf32>
    %164 = arith.truncf %163 : vector<8x8xf32> to vector<8x8xbf16>
    %165 = arith.truncf %137 : vector<8x32xf32> to vector<8x32xbf16>
    %cst_78 = arith.constant dense<0.000000e+00> : vector<8x32xf32>
    %166 = tpu.matmul %164, %165, %cst_78 {dimension_numbers = #tpu.dot_dimension_numbers<[1], [0], [0], [1], [0, 0, 1, 1], [], []>} : vector<8x8xbf16>, vector<8x32xbf16>, vector<8x32xf32> -> vector<8x32xf32>
    %c0_79 = arith.constant 0 : index
    %c0_80 = arith.constant 0 : index
    %167 = vector.load %arg15[%c0_79, %c0_80] : memref<1x32xf32, #tpu.memory_space<vmem>>, vector<1x32xf32>
    %168 = vector.broadcast %167 : vector<1x32xf32> to vector<8x32xf32>
    %169 = arith.addf %166, %168 : vector<8x32xf32>
    %cst_81 = arith.constant 0.000000e+00 : f32
    %170 = vector.broadcast %cst_81 : f32 to vector<8x32xf32>
    %171 = arith.maximumf %169, %170 : vector<8x32xf32>
    %cst_82 = arith.constant dense<0.000000e+00> : vector<8xf32>
    %172 = vector.multi_reduction <add>, %171, %cst_82 [1] : vector<8x32xf32> to vector<8xf32>
    %173 = vector.shape_cast %172 : vector<8xf32> to vector<8x1xf32>
    %cst_83 = arith.constant 3.200000e+01 : f32
    %174 = vector.broadcast %cst_83 : f32 to vector<8x1xf32>
    %175 = arith.divf %173, %174 : vector<8x1xf32>
    %176 = vector.broadcast %175 : vector<8x1xf32> to vector<8x32xf32>
    %177 = arith.subf %171, %176 : vector<8x32xf32>
    %178 = vector.broadcast %175 : vector<8x1xf32> to vector<8x32xf32>
    %179 = arith.subf %171, %178 : vector<8x32xf32>
    %180 = arith.mulf %177, %179 : vector<8x32xf32>
    %cst_84 = arith.constant dense<0.000000e+00> : vector<8xf32>
    %181 = vector.multi_reduction <add>, %180, %cst_84 [1] : vector<8x32xf32> to vector<8xf32>
    %182 = vector.shape_cast %181 : vector<8xf32> to vector<8x1xf32>
    %cst_85 = arith.constant 3.200000e+01 : f32
    %183 = vector.broadcast %cst_85 : f32 to vector<8x1xf32>
    %184 = arith.divf %182, %183 : vector<8x1xf32>
    %cst_86 = arith.constant 9.99999974E-6 : f32
    %185 = vector.broadcast %cst_86 : f32 to vector<8x1xf32>
    %186 = arith.addf %184, %185 : vector<8x1xf32>
    %187 = math.rsqrt %186 : vector<8x1xf32>
    %188 = vector.broadcast %175 : vector<8x1xf32> to vector<8x32xf32>
    %189 = arith.subf %171, %188 : vector<8x32xf32>
    %190 = vector.broadcast %187 : vector<8x1xf32> to vector<8x32xf32>
    %191 = arith.mulf %189, %190 : vector<8x32xf32>
    %c0_87 = arith.constant 0 : index
    %c0_88 = arith.constant 0 : index
    %192 = vector.load %arg18[%c0_87, %c0_88] : memref<1x32xf32, #tpu.memory_space<vmem>>, vector<1x32xf32>
    %193 = vector.broadcast %192 : vector<1x32xf32> to vector<8x32xf32>
    %194 = arith.mulf %191, %193 : vector<8x32xf32>
    %c0_89 = arith.constant 0 : index
    %c0_90 = arith.constant 0 : index
    %195 = vector.load %arg19[%c0_89, %c0_90] : memref<1x32xf32, #tpu.memory_space<vmem>>, vector<1x32xf32>
    %196 = vector.broadcast %195 : vector<1x32xf32> to vector<8x32xf32>
    %197 = arith.addf %194, %196 : vector<8x32xf32>
    %c0_91 = arith.constant 0 : index
    %c0_92 = arith.constant 0 : index
    %198 = vector.load %arg29[%c0_91, %c0_92] : memref<8x32xf32, #tpu.memory_space<vmem>>, vector<8x32xf32>
    tpu.vector_store %arg29[%c0_91, %c0_92], %171 {strides = array<i32>} : memref<8x32xf32, #tpu.memory_space<vmem>>, vector<8x32xf32>,
    %c0_93 = arith.constant 0 : index
    %c0_94 = arith.constant 0 : index
    %199 = vector.load %arg26[%c0_93, %c0_94] : memref<8x32xf32, #tpu.memory_space<vmem>>, vector<8x32xf32>
    tpu.vector_store %arg26[%c0_93, %c0_94], %169 {strides = array<i32>} : memref<8x32xf32, #tpu.memory_space<vmem>>, vector<8x32xf32>,
    %c0_95 = arith.constant 0 : index
    %c0_96 = arith.constant 0 : index
    %200 = vector.load %arg20[%c0_95, %c0_96] : memref<32x32xf32, #tpu.memory_space<vmem>>, vector<32x32xf32>
    %201 = arith.truncf %197 : vector<8x32xf32> to vector<8x32xbf16>
    %202 = arith.truncf %200 : vector<32x32xf32> to vector<32x32xbf16>
    %cst_97 = arith.constant dense<0.000000e+00> : vector<8x32xf32>
    %203 = tpu.matmul %201, %202, %cst_97 {dimension_numbers = #tpu.dot_dimension_numbers<[1], [0], [0], [1], [0, 0, 1, 1], [], []>} : vector<8x32xbf16>, vector<32x32xbf16>, vector<8x32xf32> -> vector<8x32xf32>
    %c0_98 = arith.constant 0 : index
    %c0_99 = arith.constant 0 : index
    %204 = vector.load %arg21[%c0_98, %c0_99] : memref<1x32xf32, #tpu.memory_space<vmem>>, vector<1x32xf32>
    %205 = vector.broadcast %204 : vector<1x32xf32> to vector<8x32xf32>
    %206 = arith.addf %203, %205 : vector<8x32xf32>
    %c0_100 = arith.constant 0 : index
    %c0_101 = arith.constant 0 : index
    %207 = vector.load %arg22[%c0_100, %c0_101] : memref<32x16xf32, #tpu.memory_space<vmem>>, vector<32x16xf32>
    %208 = arith.truncf %206 : vector<8x32xf32> to vector<8x32xbf16>
    %209 = arith.truncf %207 : vector<32x16xf32> to vector<32x16xbf16>
    %cst_102 = arith.constant dense<0.000000e+00> : vector<8x16xf32>
    %210 = tpu.matmul %208, %209, %cst_102 {dimension_numbers = #tpu.dot_dimension_numbers<[1], [0], [0], [1], [0, 0, 1, 1], [], []>} : vector<8x32xbf16>, vector<32x16xbf16>, vector<8x16xf32> -> vector<8x16xf32>
    %c0_103 = arith.constant 0 : index
    %c0_104 = arith.constant 0 : index
    %211 = vector.load %arg23[%c0_103, %c0_104] : memref<1x16xf32, #tpu.memory_space<vmem>>, vector<1x16xf32>
    %212 = vector.broadcast %211 : vector<1x16xf32> to vector<8x16xf32>
    %213 = arith.addf %210, %212 : vector<8x16xf32>
    %c0_105 = arith.constant 0 : index
    %c0_106 = arith.constant 0 : index
    %214 = vector.load %arg24[%c0_105, %c0_106] : memref<16x4xf32, #tpu.memory_space<vmem>>, vector<16x4xf32>
    %215 = arith.truncf %213 : vector<8x16xf32> to vector<8x16xbf16>
    %216 = arith.truncf %214 : vector<16x4xf32> to vector<16x4xbf16>
    %cst_107 = arith.constant dense<0.000000e+00> : vector<8x4xf32>
    %217 = tpu.matmul %215, %216, %cst_107 {dimension_numbers = #tpu.dot_dimension_numbers<[1], [0], [0], [1], [0, 0, 1, 1], [], []>} : vector<8x16xbf16>, vector<16x4xbf16>, vector<8x4xf32> -> vector<8x4xf32>
    %c0_108 = arith.constant 0 : index
    %c0_109 = arith.constant 0 : index
    %218 = vector.load %arg25[%c0_108, %c0_109] : memref<1x4xf32, #tpu.memory_space<vmem>>, vector<1x4xf32>
    %219 = vector.broadcast %218 : vector<1x4xf32> to vector<8x4xf32>
    %220 = arith.addf %217, %219 : vector<8x4xf32>
    %cst_110 = arith.constant dense<0xFF800000> : vector<8xf32>
    %221 = vector.multi_reduction <maximumf>, %220, %cst_110 [1] : vector<8x4xf32> to vector<8xf32>
    %222 = vector.shape_cast %221 : vector<8xf32> to vector<8x1xf32>
    %223 = vector.broadcast %222 : vector<8x1xf32> to vector<8x4xf32>
    %224 = arith.subf %220, %223 : vector<8x4xf32>
    %225 = math.exp %224 : vector<8x4xf32>
    %cst_111 = arith.constant dense<0.000000e+00> : vector<8xf32>
    %226 = vector.multi_reduction <add>, %225, %cst_111 [1] : vector<8x4xf32> to vector<8xf32>
    %227 = vector.shape_cast %226 : vector<8xf32> to vector<8x1xf32>
    %228 = math.log %227 : vector<8x1xf32>
    %229 = vector.broadcast %228 : vector<8x1xf32> to vector<8x4xf32>
    %230 = arith.subf %224, %229 : vector<8x4xf32>
    %c0_112 = arith.constant 0 : index
    %c0_113 = arith.constant 0 : index
    %231 = vector.load %arg30[%c0_112, %c0_113] : memref<8x4xf32, #tpu.memory_space<vmem>>, vector<8x4xf32>
    tpu.vector_store %arg30[%c0_112, %c0_113], %230 {strides = array<i32>} : memref<8x4xf32, #tpu.memory_space<vmem>>, vector<8x4xf32>,
    return
  }
}

</mosaic_0001>

<bundles_post_ra>
// kernel: gnn_forward.1
= control target key start
LH: loop header
LB: loop body
LE: loop exit
PB: predicated region body
PF: predicated region fallthrough
CT: control target
= control target key end

     0   :  { %s1779_s6 = smov 1   ;;  %s1780_s10 = smov 2   ;;  %s2152_s0 = inlined_call_operand.smem [shape: u32[31], index: -1, kind: input, shape index: {}] }
   0x1   :  { %s1824_s5 = sld [smem:[%s2152_s0]]   ;;  %s1781_s14 = smov 3  }
   0x2   :  { %s1829_s9 = sld [smem:[%s2152_s0 + %s1779_s6]]   ;;  %s1782_s18 = smov 4  }
   0x3   :  { %s1834_s13 = sld [smem:[%s2152_s0 + %s1780_s10]]   ;;  %s1783_s22 = smov 5  }
   0x4   :  { %s1839_s17 = sld [smem:[%s2152_s0 + %s1781_s14]]   ;;  %s1784_s26 = smov 6  }
   0x5   :  { %s1844_s21 = sld [smem:[%s2152_s0 + %s1782_s18]]   ;;  %s1785_s30 = smov 7  }
   0x6   :  { %s1849_s25 = sld [smem:[%s2152_s0 + %s1783_s22]]   ;;  %s1786_s4 = smov 8  }
   0x7   :  { %s1854_s29 = sld [smem:[%s2152_s0 + %s1784_s26]]   ;;  %s1787_s10 = smov 9  }
   0x8   :  { %s1859_s3 = sld [smem:[%s2152_s0 + %s1785_s30]]   ;;  %s1788_s15 = smov 10  }
   0x9   :  { %s1864_s8 = sld [smem:[%s2152_s0 + %s1786_s4]]   ;;  %s1789_s20 = smov 11  }
   0xa   :  { %s1869_s14 = sld [smem:[%s2152_s0 + %s1787_s10]]   ;;  %s1790_s26 = smov 12  }
   0xb   :  { %s1874_s19 = sld [smem:[%s2152_s0 + %s1788_s15]]   ;;  %s1791_s1 = smov 13  }
   0xc   :  { %s1879_s24 = sld [smem:[%s2152_s0 + %s1789_s20]]   ;;  %s1792_s7 = smov 14  }
   0xd   :  { %s1884_s30 = sld [smem:[%s2152_s0 + %s1790_s26]]   ;;  %s1793_s15 = smov 15  }
   0xe   :  { %s1889_s6 = sld [smem:[%s2152_s0 + %s1791_s1]]   ;;  %s1794_s22 = smov 16  }
   0xf   :  { %s1894_s12 = sld [smem:[%s2152_s0 + %s1792_s7]]   ;;  %s1795_s28 = smov 17  }
  0x10   :  { %s1899_s20 = sld [smem:[%s2152_s0 + %s1793_s15]]   ;;  %s1796_s7 = smov 18  }
  0x11   :  { %s1904_s27 = sld [smem:[%s2152_s0 + %s1794_s22]]   ;;  %s1797_s15 = smov 19  }
  0x12   :  { %s1909_s4 = sld [smem:[%s2152_s0 + %s1795_s28]]   ;;  %s1798_s22 = smov 20  }
  0x13   :  { %2157 = sst [smem:[#allocation12_spill]] %s1884_s30  ;;  %s1799_s28 = smov 21  }
  0x14   :  { %2158 = sst [smem:[#allocation13_spill]] %s1889_s6 }
  0x15   :  { %s1914_s6 = sld [smem:[%s2152_s0 + %s1796_s7]]   ;;  %s1800_s7 = smov 22  }
  0x16   :  { %2159 = sst [smem:[#allocation14_spill]] %s1899_s20 }
  0x17   :  { %2160 = sst [smem:[#allocation15_spill]] %s1904_s27 }
  0x18   :  { %s1919_s20 = sld [smem:[%s2152_s0 + %s1797_s15]]   ;;  %s1801_s15 = smov 23  }
  0x19   :  { %s1924_s30 = sld [smem:[%s2152_s0 + %s1798_s22]]   ;;  %s1802_s22 = smov 24  }
  0x1a   :  { %s1929_s27 = sld [smem:[%s2152_s0 + %s1799_s28]]   ;;  %s1803_s28 = smov 25  }
  0x1b   :  { %2161 = sst [smem:[#allocation16_spill]] %s1914_s6 }
  0x1c   :  { %s1934_s6 = sld [smem:[%s2152_s0 + %s1800_s7]]   ;;  %s1804_s7 = smov 26  }
  0x1e   :  { %2162 = sst [smem:[#allocation17_spill]] %s1919_s20 }
  0x1f   :  { %2163 = sst [smem:[#allocation18_spill]] %s1924_s30 }
  0x20   :  { %2164 = sst [smem:[#allocation19_spill]] %s1929_s27 }
  0x21   :  { %s1939_s20 = sld [smem:[%s2152_s0 + %s1801_s15]]   ;;  %s1805_s15 = smov 27  }
  0x22   :  { %2165 = sst [smem:[#allocation20_spill]] %s1934_s6 }
  0x23   :  { %s1944_s30 = sld [smem:[%s2152_s0 + %s1802_s22]]   ;;  %s1806_s22 = smov 28  }
  0x24   :  { %s1949_s27 = sld [smem:[%s2152_s0 + %s1803_s28]]   ;;  %s1807_s28 = smov 29  }
  0x25   :  { %s1954_s6 = sld [smem:[%s2152_s0 + %s1804_s7]]   ;;  %s1808_s7 = smov 30  }
  0x27   :  { %2166 = sst [smem:[#allocation21_spill]] %s1939_s20 }
  0x28   :  { %s1959_s20 = sld [smem:[%s2152_s0 + %s1805_s15]]  }
  0x29   :  { %2167 = sst [smem:[#allocation22_spill]] %s1944_s30 }
  0x2a   :  { %2168 = sst [smem:[#allocation23_spill]] %s1949_s27 }
  0x2b   :  { %2169 = sst [smem:[#allocation24_spill]] %s1954_s6 }
  0x2c   :  { %s1964_s30 = sld [smem:[%s2152_s0 + %s1806_s22]]  }
  0x2d   :  { %s1969_s27 = sld [smem:[%s2152_s0 + %s1807_s28]]  }
  0x2e   :  { %s1974_s6 = sld [smem:[%s2152_s0 + %s1808_s7]]  }
  0x2f   :  { %67 = vsyncpa [#allocation3], 0 }
  0x30   :  { %68 = vsyncpa [#allocation5], 0  ;;  %v128_v0 = vld [vmem:[%s1834_s13] sm:$0xff]  ;;  %v129_v1 = vld [vmem:[%s1834_s13 + $0x8] sm:$0xff]  ;;  %v1809_v3 = vmov 0.0   ;;  %vm1810_vm0 = vmmov 0  }
  0x31   :  { %v127_v2 = vld [vmem:[%s1824_s5] sm:$0xff]  ;;  %1522 = vmatprep.subr.bf16.mxu1 %v1809_v3  ;;  %v131_v4 = vpack.c.bf16 %v129_v1, %v128_v0  ;;  %1524 = vmatprep.mubr.msk.bf16.mxu1 %vm1810_vm0, %v1809_v3  ;;  %vm132_vm1 = vcmask 130048   ;;  %v255_v7 = vld [vmem:[%s1844_s21 + $0x8] sm:$0xff] }
  0x32   :  { %v254_v5 = vld [vmem:[%s1844_s21] sm:$0xff]  ;;  %v130_v6 = vpack.c.bf16 %v127_v2, %v127_v2  ;;  %1539 = vmatprep.subr.mxu0 %v1809_v3  ;;  %1541 = vmatprep.mubr.msk.f32.mxu0 %vm1810_vm0, %v1809_v3 }
  0x33   :  { %258 = vxpose.xlu0.b32.start [1/4] (short) (narrow) %v254_v5, 8  ;;  %1523 = vmatpush3.bf16.msra.mxu1 %v131_v4 }
  0x34   :  { %69 = vsyncpa [#allocation8], 0  ;;  %1528 = vmatprep.subr.mxu1 %v1809_v3  ;;  %v179_v8 = vld [vmem:[%s1849_s25 + $0x18] sm:$0xff]  ;;  %v178_v9 = vld [vmem:[%s1849_s25 + $0x10] sm:$0xff]  ;;  %v1811_v14 = vmov 0   ;;  %vm180_vm2 = vcmask 261120   ;;  %v368_v26 = vlaneseq }
  0x35   :  { %v177_v10 = vld [vmem:[%s1849_s25 + $0x8] sm:$0xff]  ;;  %v176_v11 = vld [vmem:[%s1849_s25] sm:$0xff]  ;;  %v256_v12 = vld [vmem:[%s1844_s21 + $0x10] sm:$0xff]  ;;  %1669 = vset.pattern.permute.xlu1 %v1811_v14  ;;  %vm405_vm3 = vcmask 1043456   ;;  %vm380_vm7 = vcmask 64512   ;;  %s2172_s0 = sld [smem:[#allocation15_spill]] }
  0x36   :  { %1525 = vmatmul.mubr.msk.bf16.vlgmr.msra.gmra.mxu1 %vm132_vm1, %v130_v6  ;;  %v257_v13 = vld [vmem:[%s1844_s21 + $0x18] sm:$0xff]  ;;  %v369_v27 = vshrl.u32 %v368_v26, 7  ;;  %v125_v28 = vld [vmem:[%s1829_s9] sm:$0xf]  ;;  %v483_v63 = vld [vmem:[%s1864_s8 + $0x10] sm:$0xff]  ;;  %s2173_s5 = sld [smem:[#allocation12_spill]] }
  0x37   :  { %259 = vxpose.xlu0.b32.cont [2/4] (short) (narrow) %v255_v7, 8  ;;  %1529 = vmatpush3.msra.mxu1 %v179_v8  ;;  %vm126_vm4 = vcmp.gt.bf16.partialorder %v125_v28, 0  ;;  %v1453_v50 = vld [vmem:[%s1839_s17] ss:$0 sm:$0xff]  ;;  %v484_v0 = vld [vmem:[%s1864_s8 + $0x18] sm:$0xff]  ;;  %v482_v4 = vld [vmem:[%s1864_s8 + $0x8] sm:$0xff] }
  0x38   :  { %1536 = vmatprep.mubr.msk.f32.mxu1 %vm1810_vm0, %v1809_v3  ;;  %1530 = vmatprep.subr.mxu1 %v1809_v3  ;;  %v2012_v29 = vsub.s32 0, %v369_v27  ;;  %v376_v30 = vsel %vm126_vm4, 65537, %v1811_v14  ;;  %v487_v1 = vpack.c.bf16 %v484_v0, %v483_v63  ;;  %v481_v2 = vld [vmem:[%s1864_s8] sm:$0xff]  ;;  %v534_v6 = vld [vmem:[%s1879_s24 + $0x18] sm:$0xff]  ;;  %v533_v7 = vld [vmem:[%s1879_s24 + $0x10] sm:$0xff]  ;;  %s2174_s9 = sld [smem:[#allocation13_spill]] }
  0x39   :  { %1531 = vmatpush3.msra.mxu1 %v178_v9  ;;  %v377_v32 = vunpack.c.l.b16 %v376_v30  ;;  %v486_v5 = vpack.c.bf16 %v482_v4, %v481_v2  ;;  %v532_v8 = vld [vmem:[%s1879_s24 + $0x8] sm:$0xff]  ;;  %v531_v9 = vld [vmem:[%s1879_s24] sm:$0xff]  ;;  %v831_v4 = vld [vmem:[%s1894_s12 + $0x10] sm:$0xff]  ;;  %s2175_s13 = sld [smem:[#allocation14_spill]]  ;;  %vm1346_vm10 = vcmask 31744   ;;  %s1812_s24 = smov [#allocation4]  }
  0x3a   :  { %1532 = vmatprep.subr.mxu1 %v1809_v3  ;;  %s2176_s17 = sld [smem:[#allocation18_spill]] }
  0x3b   :  { %1533 = vmatpush3.msra.mxu1 %v177_v10  ;;  %260 = vxpose.xlu0.b32.cont [3/4] (short) (narrow) %v256_v12, 8  ;;  %vm2015_vm6 = vcmp.ne.s32.totalorder %v377_v32, 0  ;;  %v608_v10 = vld [vmem:[%s1874_s19] sm:$0xff]  ;;  %s2177_s21 = sld [smem:[#allocation20_spill]] }
  0x3c   :  { %1534 = vmatprep.subr.mxu1 %v1809_v3  ;;  %s2178_s25 = sld [smem:[#allocation16_spill]] }
  0x3d   :  { %1535 = vmatpush3.msra.mxu1 %v176_v11  ;;  %v609_v11 = vld [vmem:[%s1874_s19 + $0x8] sm:$0xff]  ;;  %s2181_s8 = sld [smem:[#allocation19_spill]] }
  0x3e   :  { %1544 = vmatprep.subr.bf16.mxu1 %v1809_v3 }
  0x3f   :  { %261 = vxpose.xlu0.b32.end [4/4] (short) (narrow) %v257_v13, 8  ;;  %v1469_v36 = vld [vmem:[%s2175_s13] ss:$0 sm:$0xff] }
  0x68   :  { %1670 = vset.pattern.permute.xlu0 %v1811_v14 }
  0xaf   :  { %v274_v17 = vpop.trf.xlu0 }
  0xf6   :  { %v170_v15 = vpop.f32.mrf.mxu1 }
  0xf7   :  { %v394_v16 = vpack.c.bf16 %v170_v15, %v170_v15  ;;  %1537 = vmatmul.mubr.msk.f32.vlgmr.msra.gmra.mxu1 %vm180_vm2, %v170_v15  ;;  %1540 = vmatpush3.xpose.msk.msra.mxu0 %vm180_vm2, %v170_v15 }
  0xf8   :  { %v1526_v18 = vpop.f32.mrf.mxu1  ;;  %1546 = vmatprep.mubr.msk.bf16.mxu1 %vm1810_vm0, %v1809_v3  ;;  %1550 = vmatprep.subr.bf16.mxu0 %v1809_v3 }
  0xf9   :  { %v407_v19 = vsel %vm405_vm3, %v394_v16, 0  ;;  %v1455_v16 = vld [vmem:[%s1854_s29] ss:$0 sm:$0xff]  ;;  %s2179_s29 = sld [smem:[#allocation17_spill]] }
  0xfa   :  { %v173_v20 = vpop.f32.mrf.mxu1  ;;  %1545 = vmatpush3.bf16.msra.mxu1 %v407_v19  ;;  %1542 = vmatmul.mubr.msk.f32.vlgmr.msra.gmra.mxu0 %vm180_vm2, %v274_v17  ;;  %v1456_v18 = vld [vmem:[%s1859_s3] ss:$0 sm:$0xff]  ;;  %s2180_s3 = sld [smem:[#allocation22_spill]] }
  0xfb   :  { %1554 = vmatprep.mubr.msk.bf16.mxu0 %vm1810_vm0, %v1809_v3  ;;  %1558 = vmatprep.subr.mxu1 %v1809_v3 }
  0xfc   :  { %v1527_v21 = vpop.f32.mrf.mxu1  ;;  %1551 = vmatpush3.bf16.msra.mxu0 %v487_v1 }
  0xfd   :  { %1552 = vmatprep.subr.bf16.mxu0 %v1809_v3 }
 0x100   :  { %1553 = vmatpush3.bf16.msra.mxu0 %v486_v5  ;;  %v832_v5 = vld [vmem:[%s1894_s12 + $0x18] sm:$0xff] }
 0x101   :  { %1574 = vmatprep.subr.bf16.mxu0 %v1809_v3 }
 0x1b7   :  { %v250_v22 = vpop.f32.mrf.mxu1 }
 0x1b8   :  { %365 = vperm.xlu1 %1669, %v250_v22   ;;  %v610_v22 = vld [vmem:[%s1874_s19 + $0x10] sm:$0xff] }
 0x1b9   :  { %v1538_v23 = vpop.f32.mrf.mxu1 }
 0x1ba   :  { %v359_v24 = vpop.f32.mrf.mxu0  ;;  %v611_v23 = vld [vmem:[%s1874_s19 + $0x18] sm:$0xff]  ;;  %s2183_s19 = sld [smem:[#allocation23_spill]] }
 0x1bb   :  { %v371_v31 = vrot.slane %v359_v24, %v2012_v29 }
 0x1bc   :  { %v1543_v25 = vpop.f32.mrf.mxu0 }
 0x233   :  { %v366_v33 = vpop.permute.xlu1 %365 }
 0x234   :  { %v372_v34 = vadd.f32 %v371_v31, %v366_v33 }
 0x236   :  { %v374_v35 = vmul.f32 0.2, %v372_v34  ;;  %vm373_vm5 = vcmp.gt.f32.partialorder %v372_v34, 0.0 }
 0x238   :  { %v375_v37 = vsel %vm373_vm5, %v372_v34, %v374_v35 }
 0x239   :  { %v379_v38 = vsel %vm2015_vm6, %v375_v37, -1e+30 }
 0x23a   :  { %v381_v39 = vsel %vm380_vm7, %v379_v38, -inf }
 0x23b   :  { %382 = vmax.xlane.f32.xlu1 %v381_v39 }
 0x2c4   :  { %v383_v40 = vpop.xlane.xlu1 %382 }
 0x2c5   :  { %v384_v41 = vsub.f32 %v379_v38, %v383_v40 }
 0x2c7   :  { %v385_v42 = vmul.f32 1.442695, %v384_v41 }
 0x2c9   :  { %1671 = vpow2.f32 %v385_v42 }
 0x2d6   :  { %v1672_v43 = vpop.eup %1671 }
 0x2d7   :  { %v387_v44 = vsel %vm380_vm7, %v1672_v43, 0.0 }
 0x2d8   :  { %388 = vadd.xlane.f32.xlu0 %v387_v44 }
 0x361   :  { %v389_v45 = vpop.xlane.xlu0 %388 }
 0x362   :  { %v390_v46 = vmax.f32 %v389_v45, 1e-20 }
 0x364   :  { %1673 = vrcp.f32 %v390_v46 }
 0x371   :  { %v1674_v47 = vpop.eup %1673 }
 0x372   :  { %v392_v48 = vmul.f32 %v1674_v47, %v1672_v43 }
 0x374   :  { %v393_v49 = vpack.c.bf16 %v392_v48, %v392_v48 }
 0x376   :  { %1547 = vmatmul.mubr.msk.bf16.vlgmr.msra.gmra.mxu1 %vm380_vm7, %v393_v49 }
 0x377   :  { %1566 = vmatprep.mubr.msk.f32.mxu1 %vm1810_vm0, %v1809_v3  ;;  %1559 = vmatpush3.msra.mxu1 %v534_v6  ;;  %v835_v6 = vpack.c.bf16 %v832_v5, %v831_v4 }
 0x378   :  { %1560 = vmatprep.subr.mxu1 %v1809_v3 }
 0x379   :  { %1561 = vmatpush3.msra.mxu1 %v533_v7  ;;  %v829_v7 = vld [vmem:[%s1894_s12] sm:$0xff] }
 0x37a   :  { %1562 = vmatprep.subr.mxu1 %v1809_v3 }
 0x37b   :  { %1563 = vmatpush3.msra.mxu1 %v532_v8  ;;  %v830_v8 = vld [vmem:[%s1894_s12 + $0x8] sm:$0xff]  ;;  %s1376_s12 = sshll.u32 %s1812_s24, 4  ;;  %s1377_s12 = int_to_ptr.vmem [resolvable:$true] %s1376_s12 }
 0x37c   :  { %1564 = vmatprep.subr.mxu1 %v1809_v3  ;;  %s1693_s16 = scalar_lea.vmem %s1377_s12, 128  ;;  %p1698_p1 = scmp.lt.s32.totalorder %s1377_s12, %s1377_s12 }
 0x37d   :  { %1565 = vmatpush3.msra.mxu1 %v531_v9  ;;  %v834_v9 = vpack.c.bf16 %v830_v8, %v829_v7  ;;  %v1181_v7 = vld [vmem:[%s2176_s17 + $0x18] sm:$0xff]  ;;  %p1694_p0 = scmp.ne.s32.totalorder %s1377_s12, %s1693_s16  ;;  %p1699_p2 = scmp.lt.s32.totalorder %s1693_s16, %s1693_s16 }
 0x37e   :  { %1569 = vmatprep.subr.mxu1 %v1809_v3 }
 0x37f   :  { %p1700_p3 = por %p1699_p2, %p1698_p1 }
 0x381   :  { %p1701_p4 = pnand %p1700_p3, %p1694_p0 }
 0x436   :  { %v443_v51 = vpop.f32.mrf.mxu1 }
 0x437   :  { %v444_v52 = vadd.f32 %v1453_v50, %v443_v51 }
 0x438   :  { %v1548_v53 = vpop.f32.mrf.mxu1 }
 0x439   :  { %v449_v54 = vmax.f32 %v444_v52, 0.0 }
 0x43a   :  { %v446_v55 = vpop.f32.mrf.mxu1 }
 0x43b   :  { %480 = vst.msk [vmem:[#allocation4] sm:$0xff] %vm180_vm2, %v449_v54  ;;  %v450_v56 = vsel %vm180_vm2, %v449_v54, 0.0 }
 0x43c   :  { %451 = vadd.xlane.f32.xlu1 %v450_v56  ;;  %v1549_v57 = vpop.f32.mrf.mxu1 }
 0x4c5   :  { %v452_v58 = vpop.xlane.xlu1 %451 }
 0x4c6   :  { %v454_v59 = vmul.f32 0.03125, %v452_v58 }
 0x4c8   :  { %v455_v60 = vsub.f32 %v449_v54, %v454_v59  ;;  %v1461_v54 = vld [vmem:[%s1869_s14] ss:$0 sm:$0xff]  ;;  %s2182_s14 = sld [smem:[#allocation21_spill]] }
 0x4ca   :  { %v456_v61 = vmul.f32 %v455_v60, %v455_v60 }
 0x4cc   :  { %v457_v62 = vsel %vm180_vm2, %v456_v61, 0.0 }
 0x4cd   :  { %458 = vadd.xlane.f32.xlu1 %v457_v62 }
 0x500   :  { %612 = vxpose.xlu1.b32.start [1/4] (short) (narrow) %v608_v10, 8  ;;  %v882_v10 = vld [vmem:[%s1909_s4 + $0x18] sm:$0xff] }
 0x504   :  { %613 = vxpose.xlu1.b32.cont [2/4] (short) (narrow) %v609_v11, 8  ;;  %v881_v11 = vld [vmem:[%s1909_s4 + $0x10] sm:$0xff] }
 0x508   :  { %614 = vxpose.xlu1.b32.cont [3/4] (short) (narrow) %v610_v22, 8  ;;  %v1464_v22 = vld [vmem:[%s2174_s9] ss:$0 sm:$0xff] }
 0x50c   :  { %615 = vxpose.xlu1.b32.end [4/4] (short) (narrow) %v611_v23, 8 }
 0x556   :  { %v459_v12 = vpop.xlane.xlu1 %458 }
 0x557   :  { %v460_v13 = vmul.f32 0.03125, %v459_v12  ;;  %v880_v12 = vld [vmem:[%s1909_s4 + $0x8] sm:$0xff] }
 0x559   :  { %v461_v14 = vadd.f32 1e-05, %v460_v13  ;;  %v879_v13 = vld [vmem:[%s1909_s4] sm:$0xff]  ;;  %s1813_s4 = smov [#allocation2]  }
 0x55a   :  { %s1366_s15 = sshll.u32 %s1813_s4, 4  ;;  %s1367_s15 = int_to_ptr.vmem [resolvable:$true] %s1366_s15 }
 0x55b   :  { %1675 = vrsqrt.f32 %v461_v14  ;;  %v956_v14 = vld [vmem:[%s2172_s0] sm:$0xff] }
 0x568   :  { %v1676_v15 = vpop.eup %1675 }
 0x569   :  { %v463_v17 = vmul.f32 %v1676_v15, %v455_v60  ;;  %v957_v15 = vld [vmem:[%s2172_s0 + $0x8] sm:$0xff] }
 0x56b   :  { %v471_v19 = vmul.f32 %v1455_v16, %v463_v17 }
 0x56d   :  { %v479_v20 = vadd.f32 %v1456_v18, %v471_v19 }
 0x56f   :  { %v485_v21 = vpack.c.bf16 %v479_v20, %v479_v20  ;;  %v1463_v20 = vld [vmem:[%s2173_s5] ss:$0 sm:$0xff] }
 0x571   :  { %1555 = vmatmul.mubr.msk.bf16.vlgmr.msra.gmra.mxu0 %vm180_vm2, %v485_v21 }
 0x572   :  { %1576 = vmatprep.mubr.msk.bf16.mxu0 %vm1810_vm0, %v1809_v3 }
 0x57c   :  { %v628_v27 = vpop.trf.xlu1 }
 0x631   :  { %v525_v24 = vpop.f32.mrf.mxu0 }
 0x632   :  { %v744_v25 = vpack.c.bf16 %v525_v24, %v525_v24  ;;  %1567 = vmatmul.mubr.msk.f32.vlgmr.msra.gmra.mxu1 %vm180_vm2, %v525_v24 }
 0x633   :  { %1570 = vmatpush3.xpose.msk.msra.mxu1 %vm180_vm2, %v525_v24  ;;  %v1556_v26 = vpop.f32.mrf.mxu0  ;;  %1571 = vmatprep.mubr.msk.f32.mxu1 %vm1810_vm0, %v1809_v3 }
 0x634   :  { %v756_v28 = vsel %vm405_vm3, %v744_v25, 0  ;;  %1580 = vmatprep.subr.bf16.mxu1 %v1809_v3  ;;  %v958_v26 = vld [vmem:[%s2172_s0 + $0x10] sm:$0xff] }
 0x635   :  { %v528_v30 = vpop.f32.mrf.mxu0  ;;  %1575 = vmatpush3.bf16.msra.mxu0 %v756_v28 }
 0x636   :  { %1572 = vmatmul.mubr.msk.f32.vlgmr.msra.gmra.mxu1 %vm180_vm2, %v628_v27  ;;  %1588 = vmatprep.subr.mxu0 %v1809_v3  ;;  %v959_v27 = vld [vmem:[%s2172_s0 + $0x18] sm:$0xff] }
 0x637   :  { %v1557_v31 = vpop.f32.mrf.mxu0  ;;  %1584 = vmatprep.mubr.msk.bf16.mxu1 %vm1810_vm0, %v1809_v3  ;;  %1581 = vmatpush3.bf16.msra.mxu1 %v835_v6  ;;  %v1180_v6 = vld [vmem:[%s2176_s17 + $0x10] sm:$0xff] }
 0x638   :  { %1582 = vmatprep.subr.bf16.mxu1 %v1809_v3  ;;  %v1184_v8 = vpack.c.bf16 %v1181_v7, %v1180_v6 }
 0x63b   :  { %1583 = vmatpush3.bf16.msra.mxu1 %v834_v9  ;;  %v1178_v9 = vld [vmem:[%s2176_s17] sm:$0xff] }
 0x63c   :  { %1604 = vmatprep.subr.bf16.mxu1 %v1809_v3 }
 0x6f2   :  { %v604_v32 = vpop.f32.mrf.mxu1 }
 0x6f3   :  { %719 = vperm.xlu0 %1670, %v604_v32  }
 0x6f4   :  { %v1568_v33 = vpop.f32.mrf.mxu1 }
 0x6f6   :  { %v713_v34 = vpop.f32.mrf.mxu1 }
 0x6f7   :  { %v725_v37 = vrot.slane %v713_v34, %v2012_v29 }
 0x6f8   :  { %v1573_v35 = vpop.f32.mrf.mxu1 }
 0x76e   :  { %v720_v38 = vpop.permute.xlu0 %719 }
 0x76f   :  { %v726_v39 = vadd.f32 %v725_v37, %v720_v38 }
 0x771   :  { %v728_v40 = vmul.f32 0.2, %v726_v39  ;;  %vm727_vm8 = vcmp.gt.f32.partialorder %v726_v39, 0.0 }
 0x773   :  { %v729_v41 = vsel %vm727_vm8, %v726_v39, %v728_v40 }
 0x774   :  { %v730_v42 = vsel %vm2015_vm6, %v729_v41, -1e+30 }
 0x775   :  { %v731_v43 = vsel %vm380_vm7, %v730_v42, -inf }
 0x776   :  { %732 = vmax.xlane.f32.xlu0 %v731_v43 }
 0x7ff   :  { %v733_v44 = vpop.xlane.xlu0 %732 }
 0x800   :  { %v734_v45 = vsub.f32 %v730_v42, %v733_v44 }
 0x802   :  { %v735_v46 = vmul.f32 1.442695, %v734_v45 }
 0x804   :  { %1677 = vpow2.f32 %v735_v46 }
 0x811   :  { %v1678_v47 = vpop.eup %1677 }
 0x812   :  { %v737_v48 = vsel %vm380_vm7, %v1678_v47, 0.0 }
 0x813   :  { %738 = vadd.xlane.f32.xlu1 %v737_v48 }
 0x89c   :  { %v739_v49 = vpop.xlane.xlu1 %738 }
 0x89d   :  { %v740_v50 = vmax.f32 %v739_v49, 1e-20 }
 0x89f   :  { %1679 = vrcp.f32 %v740_v50 }
 0x8ac   :  { %v1680_v51 = vpop.eup %1679 }
 0x8ad   :  { %v742_v52 = vmul.f32 %v1680_v51, %v1678_v47 }
 0x8af   :  { %v743_v53 = vpack.c.bf16 %v742_v52, %v742_v52 }
 0x8b1   :  { %1577 = vmatmul.mubr.msk.bf16.vlgmr.msra.gmra.mxu0 %vm380_vm7, %v743_v53 }
 0x8b2   :  { %1596 = vmatprep.mubr.msk.f32.mxu0 %vm1810_vm0, %v1809_v3  ;;  %1589 = vmatpush3.msra.mxu0 %v882_v10  ;;  %v1179_v10 = vld [vmem:[%s2176_s17 + $0x8] sm:$0xff] }
 0x8b3   :  { %1590 = vmatprep.subr.mxu0 %v1809_v3 }
 0x8b4   :  { %1591 = vmatpush3.msra.mxu0 %v881_v11  ;;  %v1183_v11 = vpack.c.bf16 %v1179_v10, %v1178_v9 }
 0x8b5   :  { %1592 = vmatprep.subr.mxu0 %v1809_v3 }
 0x8b6   :  { %1593 = vmatpush3.msra.mxu0 %v880_v12  ;;  %v1237_v12 = vld [vmem:[%s2177_s21 + $0x10] sm:$0xff] }
 0x8b7   :  { %1594 = vmatprep.subr.mxu0 %v1809_v3 }
 0x8b8   :  { %1595 = vmatpush3.msra.mxu0 %v879_v13  ;;  %v1238_v13 = vld [vmem:[%s2177_s21 + $0x18] sm:$0xff] }
 0x8b9   :  { %1599 = vmatprep.subr.mxu0 %v1809_v3 }
 0x971   :  { %v792_v55 = vpop.f32.mrf.mxu0 }
 0x972   :  { %v793_v56 = vadd.f32 %v1461_v54, %v792_v55 }
 0x973   :  { %v1578_v57 = vpop.f32.mrf.mxu0 }
 0x974   :  { %v798_v58 = vmax.f32 %v793_v56, 0.0 }
 0x975   :  { %v795_v59 = vpop.f32.mrf.mxu0 }
 0x976   :  { %828 = vst.msk [vmem:[#allocation6] sm:$0xff] %vm180_vm2, %v798_v58  ;;  %v799_v60 = vsel %vm180_vm2, %v798_v58, 0.0 }
 0x977   :  { %800 = vadd.xlane.f32.xlu0 %v799_v60  ;;  %v1579_v61 = vpop.f32.mrf.mxu0 }
 0xa00   :  { %v801_v62 = vpop.xlane.xlu0 %800 }
 0xa01   :  { %v802_v63 = vmul.f32 0.03125, %v801_v62 }
 0xa03   :  { %v803_v0 = vsub.f32 %v798_v58, %v802_v63 }
 0xa05   :  { %v804_v1 = vmul.f32 %v803_v0, %v803_v0 }
 0xa07   :  { %v805_v2 = vsel %vm180_vm2, %v804_v1, 0.0 }
 0xa08   :  { %806 = vadd.xlane.f32.xlu0 %v805_v2 }
 0xa35   :  { %960 = vxpose.xlu0.b32.start [1/4] (short) (narrow) %v956_v14, 8  ;;  %v1241_v14 = vpack.c.bf16 %v1238_v13, %v1237_v12 }
 0xa39   :  { %961 = vxpose.xlu0.b32.cont [2/4] (short) (narrow) %v957_v15, 8 }
 0xa3d   :  { %962 = vxpose.xlu0.b32.cont [3/4] (short) (narrow) %v958_v26, 8  ;;  %v1236_v26 = vld [vmem:[%s2177_s21 + $0x8] sm:$0xff] }
 0xa41   :  { %963 = vxpose.xlu0.b32.end [4/4] (short) (narrow) %v959_v27, 8 }
 0xa91   :  { %v807_v16 = vpop.xlane.xlu0 %806 }
 0xa92   :  { %v808_v17 = vmul.f32 0.03125, %v807_v16 }
 0xa94   :  { %v809_v18 = vadd.f32 1e-05, %v808_v17 }
 0xa96   :  { %1681 = vrsqrt.f32 %v809_v18 }
 0xaa3   :  { %v1682_v19 = vpop.eup %1681 }
 0xaa4   :  { %v811_v21 = vmul.f32 %v1682_v19, %v803_v0  ;;  %v1471_v19 = vld [vmem:[%s2178_s25] ss:$0 sm:$0xff] }
 0xaa6   :  { %v819_v23 = vmul.f32 %v1463_v20, %v811_v21  ;;  %v1472_v21 = vld [vmem:[%s2179_s29] ss:$0 sm:$0xff] }
 0xaa8   :  { %v827_v24 = vadd.f32 %v1464_v22, %v819_v23 }
 0xaaa   :  { %v833_v25 = vpack.c.bf16 %v827_v24, %v827_v24 }
 0xaac   :  { %1585 = vmatmul.mubr.msk.bf16.vlgmr.msra.gmra.mxu1 %vm180_vm2, %v833_v25  ;;  %v1235_v25 = vld [vmem:[%s2177_s21] sm:$0xff] }
 0xaad   :  { %1606 = vmatprep.mubr.msk.bf16.mxu1 %vm1810_vm0, %v1809_v3  ;;  %v1240_v27 = vpack.c.bf16 %v1236_v26, %v1235_v25 }
 0xab1   :  { %v976_v32 = vpop.trf.xlu0 }
 0xb6c   :  { %v873_v28 = vpop.f32.mrf.mxu1 }
 0xb6d   :  { %v1092_v30 = vpack.c.bf16 %v873_v28, %v873_v28  ;;  %1597 = vmatmul.mubr.msk.f32.vlgmr.msra.gmra.mxu0 %vm180_vm2, %v873_v28 }
 0xb6e   :  { %1600 = vmatpush3.xpose.msk.msra.mxu0 %vm180_vm2, %v873_v28  ;;  %v1586_v31 = vpop.f32.mrf.mxu1  ;;  %1601 = vmatprep.mubr.msk.f32.mxu0 %vm1810_vm0, %v1809_v3  ;;  %v1292_v28 = vld [vmem:[%s2180_s3] sm:$0xff] }
 0xb6f   :  { %v1104_v33 = vsel %vm405_vm3, %v1092_v30, 0  ;;  %1610 = vmatprep.subr.bf16.mxu0 %v1809_v3  ;;  %v1293_v30 = vld [vmem:[%s2180_s3 + $0x8] sm:$0xff] }
 0xb70   :  { %v876_v34 = vpop.f32.mrf.mxu1  ;;  %1605 = vmatpush3.bf16.msra.mxu1 %v1104_v33  ;;  %v1295_v31 = vpack.c.bf16 %v1293_v30, %v1292_v28 }
 0xb71   :  { %1602 = vmatmul.mubr.msk.f32.vlgmr.msra.gmra.mxu0 %vm180_vm2, %v976_v32  ;;  %1618 = vmatprep.subr.bf16.mxu1 %v1809_v3  ;;  %v1473_v32 = vld [vmem:[%s2181_s8] ss:$0 sm:$0xff] }
 0xb72   :  { %v1587_v35 = vpop.f32.mrf.mxu1  ;;  %1614 = vmatprep.mubr.msk.bf16.mxu0 %vm1810_vm0, %v1809_v3  ;;  %1611 = vmatpush3.bf16.msra.mxu0 %v1184_v8 }
 0xb73   :  { %1612 = vmatprep.subr.bf16.mxu0 %v1809_v3 }
 0xb76   :  { %1613 = vmatpush3.bf16.msra.mxu0 %v1183_v11 }
 0xb77   :  { %1626 = vmatprep.subr.bf16.mxu0 %v1809_v3 }
 0xc2d   :  { %v952_v37 = vpop.f32.mrf.mxu0 }
 0xc2e   :  { %1067 = vperm.xlu1 %1669, %v952_v37  }
 0xc2f   :  { %v1598_v38 = vpop.f32.mrf.mxu0 }
 0xc31   :  { %v1061_v39 = vpop.f32.mrf.mxu0 }
 0xc32   :  { %v1073_v41 = vrot.slane %v1061_v39, %v2012_v29 }
 0xc33   :  { %v1603_v40 = vpop.f32.mrf.mxu0 }
 0xca9   :  { %v1068_v42 = vpop.permute.xlu1 %1067 }
 0xcaa   :  { %v1074_v43 = vadd.f32 %v1073_v41, %v1068_v42 }
 0xcac   :  { %v1076_v44 = vmul.f32 0.2, %v1074_v43  ;;  %vm1075_vm9 = vcmp.gt.f32.partialorder %v1074_v43, 0.0 }
 0xcae   :  { %v1077_v45 = vsel %vm1075_vm9, %v1074_v43, %v1076_v44 }
 0xcaf   :  { %v1078_v46 = vsel %vm2015_vm6, %v1077_v45, -1e+30 }
 0xcb0   :  { %v1079_v47 = vsel %vm380_vm7, %v1078_v46, -inf }
 0xcb1   :  { %1080 = vmax.xlane.f32.xlu1 %v1079_v47 }
 0xd3a   :  { %v1081_v48 = vpop.xlane.xlu1 %1080 }
 0xd3b   :  { %v1082_v49 = vsub.f32 %v1078_v46, %v1081_v48  ;;  %v1477_v46 = vld [vmem:[%s2183_s19] ss:$0 sm:$0xff] }
 0xd3d   :  { %v1083_v50 = vmul.f32 1.442695, %v1082_v49 }
 0xd3f   :  { %1683 = vpow2.f32 %v1083_v50 }
 0xd4c   :  { %v1684_v51 = vpop.eup %1683 }
 0xd4d   :  { %v1085_v52 = vsel %vm380_vm7, %v1684_v51, 0.0 }
 0xd4e   :  { %1086 = vadd.xlane.f32.xlu0 %v1085_v52 }
 0xdd7   :  { %v1087_v29 = vpop.xlane.xlu0 %1086 }
 0xdd8   :  { %v1088_v53 = vmax.f32 %v1087_v29, 1e-20 }
 0xdda   :  { %1685 = vrcp.f32 %v1088_v53 }
 0xde7   :  { %v1686_v54 = vpop.eup %1685 }
 0xde8   :  { %v1090_v55 = vmul.f32 %v1686_v54, %v1684_v51 }
 0xdea   :  { %v1091_v56 = vpack.c.bf16 %v1090_v55, %v1090_v55 }
 0xdec   :  { %1607 = vmatmul.mubr.msk.bf16.vlgmr.msra.gmra.mxu1 %vm380_vm7, %v1091_v56 }
 0xded   :  { %1622 = vmatprep.mubr.msk.bf16.mxu1 %vm1810_vm0, %v1809_v3  ;;  %1619 = vmatpush3.bf16.msra.mxu1 %v1241_v14 }
 0xdee   :  { %1620 = vmatprep.subr.bf16.mxu1 %v1809_v3 }
 0xdf1   :  { %1621 = vmatpush3.bf16.msra.mxu1 %v1240_v27 }
 0xeac   :  { %v1140_v57 = vpop.f32.mrf.mxu1 }
 0xead   :  { %v1141_v58 = vadd.f32 %v1469_v36, %v1140_v57 }
 0xeae   :  { %v1608_v59 = vpop.f32.mrf.mxu1 }
 0xeaf   :  { %v1146_v60 = vmax.f32 %v1141_v58, 0.0  ;;  %1177 = vst.msk [vmem:[#allocation2] sm:$0xff] %vm180_vm2, %v1141_v58 }
 0xeb0   :  { %v1143_v61 = vpop.f32.mrf.mxu1 }
 0xeb1   :  { %1176 = vst.msk [vmem:[#allocation7] sm:$0xff] %vm180_vm2, %v1146_v60  ;;  %v1147_v62 = vsel %vm180_vm2, %v1146_v60, 0.0 }
 0xeb2   :  { %1148 = vadd.xlane.f32.xlu1 %v1147_v62  ;;  %v1609_v63 = vpop.f32.mrf.mxu1 }
 0xf3b   :  { %v1149_v0 = vpop.xlane.xlu1 %1148 }
 0xf3c   :  { %v1150_v1 = vmul.f32 0.03125, %v1149_v0 }
 0xf3e   :  { %v1151_v2 = vsub.f32 %v1146_v60, %v1150_v1 }
 0xf40   :  { %v1152_v4 = vmul.f32 %v1151_v2, %v1151_v2 }
 0xf42   :  { %v1153_v5 = vsel %vm180_vm2, %v1152_v4, 0.0 }
 0xf43   :  { %1154 = vadd.xlane.f32.xlu1 %v1153_v5 }
 0xfcc   :  { %v1155_v15 = vpop.xlane.xlu1 %1154 }
 0xfcd   :  { %v1156_v16 = vmul.f32 0.03125, %v1155_v15 }
 0xfcf   :  { %v1157_v17 = vadd.f32 1e-05, %v1156_v16 }
 0xfd1   :  { %1687 = vrsqrt.f32 %v1157_v17 }
 0xfde   :  { %v1688_v18 = vpop.eup %1687 }
 0xfdf   :  { %v1159_v20 = vmul.f32 %v1688_v18, %v1151_v2 }
 0xfe1   :  { %v1167_v22 = vmul.f32 %v1471_v19, %v1159_v20 }
 0xfe3   :  { %v1175_v23 = vadd.f32 %v1472_v21, %v1167_v22 }
 0xfe5   :  { %v1182_v24 = vpack.c.bf16 %v1175_v23, %v1175_v23 }
 0xfe7   :  { %1615 = vmatmul.mubr.msk.bf16.vlgmr.msra.gmra.mxu0 %vm180_vm2, %v1182_v24 }
 0xfe8   :  { %1628 = vmatprep.mubr.msk.bf16.mxu0 %vm1810_vm0, %v1809_v3  ;;  %1627 = vmatpush3.bf16.msra.mxu0 %v1295_v31  ;;  %v1475_v3 = vld [vmem:[%s2182_s14] ss:$0 sm:$0xff] }
0x10a7   :  { %v1229_v33 = vpop.f32.mrf.mxu0 }
0x10a8   :  { %v1230_v34 = vadd.f32 %v1473_v32, %v1229_v33 }
0x10a9   :  { %v1616_v35 = vpop.f32.mrf.mxu0 }
0x10aa   :  { %v1239_v37 = vpack.c.bf16 %v1230_v34, %v1230_v34 }
0x10ab   :  { %v1232_v38 = vpop.f32.mrf.mxu0 }
0x10ac   :  { %1623 = vmatmul.mubr.msk.bf16.vlgmr.msra.gmra.mxu1 %vm180_vm2, %v1239_v37 }
0x10ad   :  { %v1617_v39 = vpop.f32.mrf.mxu0 }
0x116c   :  { %v1286_v40 = vpop.f32.mrf.mxu1 }
0x116d   :  { %v1287_v41 = vadd.f32 %v1475_v3, %v1286_v40 }
0x116e   :  { %v1624_v42 = vpop.f32.mrf.mxu1 }
0x116f   :  { %v1294_v43 = vpack.c.bf16 %v1287_v41, %v1287_v41 }
0x1170   :  { %v1289_v44 = vpop.f32.mrf.mxu1 }
0x1171   :  { %1629 = vmatmul.mubr.msk.bf16.vlgmr.msra.gmra.mxu0 %vm132_vm1, %v1294_v43 }
0x1172   :  { %v1625_v45 = vpop.f32.mrf.mxu1 }
0x1231   :  { %v1340_v47 = vpop.f32.mrf.mxu0 }
0x1232   :  { %v1341_v48 = vadd.f32 %v1477_v46, %v1340_v47 }
0x1233   :  { %v1630_v49 = vpop.f32.mrf.mxu0 }
0x1234   :  { %v1347_v50 = vsel %vm1346_vm10, %v1341_v48, -inf }
0x1235   :  { %1348 = vmax.xlane.f32.xlu1 %v1347_v50  ;;  %v1343_v51 = vpop.f32.mrf.mxu0 }
0x1237   :  { %v1631_v52 = vpop.f32.mrf.mxu0 }
0x12be   :  { %v1349_v29 = vpop.xlane.xlu1 %1348 }
0x12bf   :  { %v1350_v53 = vsub.f32 %v1341_v48, %v1349_v29 }
0x12c1   :  { %v1351_v54 = vmul.f32 1.442695, %v1350_v53 }
0x12c3   :  { %1689 = vpow2.f32 %v1351_v54 }
0x12d0   :  { %v1690_v55 = vpop.eup %1689 }
0x12d1   :  { %v1353_v56 = vsel %vm1346_vm10, %v1690_v55, 0.0 }
0x12d2   :  { %1354 = vadd.xlane.f32.xlu1 %v1353_v56 }
0x12d3   :  { %1704 = shalt.err (!%p1701_p4)
}
0x12d4   :  { %1379 = dma.vmem_to_hbm [thread:$0]  %s1377_s12, 128, %s1959_s20, [#allocation5]  }
0x12d5   :  { %s1713_s18 = scalar_lea.vmem %s1367_s15, 128  ;;  %p1718_p6 = scmp.lt.s32.totalorder %s1367_s15, %s1367_s15 }
0x12d6   :  { %p1714_p5 = scmp.ne.s32.totalorder %s1367_s15, %s1713_s18  ;;  %p1719_p7 = scmp.lt.s32.totalorder %s1713_s18, %s1713_s18 }
0x12d8   :  { %p1720_p8 = por %p1719_p7, %p1718_p6 }
0x12da   :  { %p1721_p9 = pnand %p1720_p8, %p1714_p5 }
0x12dc   :  { %1724 = shalt.err (!%p1721_p9)
}
0x12dd   :  { %s2184_s22 = sld [smem:[#allocation24_spill]]  ;;  %s1814_s23 = smov [#allocation6]  }
0x12de   :  { %s1386_s26 = sshll.u32 %s1814_s23, 4  ;;  %s1815_s28 = smov [#allocation7]   ;;  %s1387_s26 = int_to_ptr.vmem [resolvable:$true] %s1386_s26 }
0x12df   :  { %s1396_s1 = sshll.u32 %s1815_s28, 4  ;;  %s1733_s2 = scalar_lea.vmem %s1387_s26, 128  ;;  %s1397_s1 = int_to_ptr.vmem [resolvable:$true] %s1396_s1 }
0x12e0   :  { %p1734_p10 = scmp.ne.s32.totalorder %s1387_s26, %s1733_s2  ;;  %p1738_p11 = scmp.lt.s32.totalorder %s1387_s26, %s1387_s26 }
0x12e1   :  { %p1739_p12 = scmp.lt.s32.totalorder %s1733_s2, %s1733_s2 }
0x12e3   :  { %1369 = dma.vmem_to_hbm [thread:$0]  %s1367_s15, 128, %s2184_s22, [#allocation3]  }
0x12e4   :  { %p1740_p13 = por %p1739_p12, %p1738_p11 }
0x12e6   :  { %p1741_p0 = pnand %p1740_p13, %p1734_p10 }
0x12e8   :  { %1744 = shalt.err (!%p1741_p0)
}
0x12e9   :  { %1389 = dma.vmem_to_hbm [thread:$0]  %s1387_s26, 128, %s1964_s30, [#allocation5]  }
0x12ea   :  { %s1753_s20 = scalar_lea.vmem %s1397_s1, 128  ;;  %p1758_p2 = scmp.lt.s32.totalorder %s1397_s1, %s1397_s1 }
0x12eb   :  { %p1754_p1 = scmp.ne.s32.totalorder %s1397_s1, %s1753_s20  ;;  %p1759_p3 = scmp.lt.s32.totalorder %s1753_s20, %s1753_s20 }
0x12ed   :  { %p1760_p4 = por %p1759_p3, %p1758_p2 }
0x12ef   :  { %p1761_p5 = pnand %p1760_p4, %p1754_p1 }
0x12f1   :  { %1764 = shalt.err (!%p1761_p5)
}
0x12f2   :  { %1399 = dma.vmem_to_hbm [thread:$0]  %s1397_s1, 128, %s1969_s27, [#allocation8]  }
0x135b   :  { %v1355_v36 = vpop.xlane.xlu1 %1354 }
0x135c   :  { %1691 = vlog2.f32 %v1355_v36 }
0x1369   :  { %v1692_v57 = vpop.eup %1691 }
0x136a   :  { %v1357_v58 = vmul.f32 0.6931472, %v1692_v57 }
0x136c   :  { %v1358_v59 = vsub.f32 %v1350_v53, %v1357_v58 }
0x136e   :  { %1359 = vst.msk [vmem:[%s1974_s6] sm:$0xff] %vm1346_vm10, %v1358_v59 }
0x136f   :  { %1773 = dma.done.wait [#allocation3], 128  }
0x1370   :  { %1774 = vsyncadd [#allocation3], 4294967168 }
0x1371   :  { %1775 = dma.done.wait [#allocation5], 256  }
0x1372   :  { %1776 = vsyncadd [#allocation5], 4294967040 }
0x1373   :  { %1777 = dma.done.wait [#allocation8], 128  }
0x1374   :  { %1778 = vsyncadd [#allocation8], 4294967168 }
0x1375   :  { %1416 = vsyncpa [#allocation3], 1 }
0x1376   :  { %1417 = vsyncpa [#allocation5], 1 }
0x1377   :  { %1418 = vsyncpa [#allocation8], 1 }

</bundles_post_ra>
